<compile_context>
chip_gen: v7x
topology: tpu7x:2x2x1
jax: 0.10.0
libtpu: 0.0.40
codegen_flags: <defaults>
</compile_context>

<pallas_src>
import functools

import jax
import jax.numpy as jnp
from jax import lax
from jax.experimental import pallas as pl
from jax.experimental.pallas import tpu as pltpu

EPS = 1e-5
LANE = 128


def _mlp_kernel(x_ref,
                w1_ref, g1_ref, be1_ref,
                w2_ref, g2_ref, be2_ref,
                w3_ref, b3_ref,
                o_ref, *, inv_b):
    """Fused Linear -> BN(train) -> ReLU -> Linear -> BN -> ReLU -> Linear.

    Weights are bf16, (in, out) layout; BN stats / affine / ReLU in f32.
    layer1/layer2 biases are omitted (cancelled exactly by BN mean subtraction).
    """

    def bn_relu(h, g, be):
        # Single-pass batch stats in f32 (biased variance, as PyTorch uses for
        # the forward value in training mode).  Clamp guards cancellation.
        mu = jnp.sum(h, axis=0, keepdims=True) * inv_b
        ex2 = jnp.sum(h * h, axis=0, keepdims=True) * inv_b
        var = jnp.maximum(ex2 - mu * mu, 0.0)
        scale = lax.rsqrt(var + EPS) * g          # (1, N) row work
        shift = be - mu * scale                   # (1, N) row work
        return jnp.maximum(h * scale + shift, 0.0)  # one FMA + max per element

    # layer1 (bf16 operands, f32 accumulation) + bn1 + relu
    h = jnp.dot(x_ref[...].astype(jnp.bfloat16), w1_ref[...],
                preferred_element_type=jnp.float32)
    h = bn_relu(h, g1_ref[...], be1_ref[...])

    # layer2 + bn2 + relu
    h = jnp.dot(h.astype(jnp.bfloat16), w2_ref[...],
                preferred_element_type=jnp.float32)
    h = bn_relu(h, g2_ref[...], be2_ref[...])

    # layer3 (bias kept: no BN after it)
    o_ref[...] = (jnp.dot(h.astype(jnp.bfloat16), w3_ref[...],
                          preferred_element_type=jnp.float32)
                  + b3_ref[...]).astype(o_ref.dtype)


def _round_up(n, m):
    return ((n + m - 1) // m) * m


def _pad2(a, rows, cols):
    r, c = a.shape
    return jnp.pad(a, ((0, rows - r), (0, cols - c)))


def prepare_params(raw):
    """One-time conversion of raw f32 params into the kernel's canonical format.

    Hidden feature dims are padded to multiples of 128 (lane-dense internal
    activations); the input dim and output dim are left at their natural width
    since those tensors are HBM-streamed.  Weights are stored bf16; BN params
    and the final bias stay f32.  Padded gamma/beta/weight entries are zero so
    padded hidden columns are exactly 0 and inert through the next matmul.
    layer1/layer2 biases are intentionally not included (BN cancels them).
    """
    in_dim = raw["w1"].shape[0]
    h1 = raw["w1"].shape[1]
    h2 = raw["w2"].shape[1]
    out_dim = raw["w3"].shape[1]
    h1p = _round_up(h1, LANE)
    h2p = _round_up(h2, LANE)

    return dict(
        w1=_pad2(raw["w1"], in_dim, h1p).astype(jnp.bfloat16),
        g1=_pad2(raw["g1"], 1, h1p),
        be1=_pad2(raw["be1"], 1, h1p),
        w2=_pad2(raw["w2"], h1p, h2p).astype(jnp.bfloat16),
        g2=_pad2(raw["g2"], 1, h2p),
        be2=_pad2(raw["be2"], 1, h2p),
        w3=_pad2(raw["w3"], h2p, out_dim).astype(jnp.bfloat16),
        b3=raw["b3"].astype(jnp.float32),
    )


def neuralnetwork_forward(x, p):
    """x: (B, in_dim) f32.  p: dict from prepare_params (padded, bf16 weights)."""
    B, in_dim = x.shape
    h1p = p["w1"].shape[1]
    h2p = p["w2"].shape[1]
    out_dim = p["w3"].shape[1]

    args = (x, p["w1"], p["g1"], p["be1"],
            p["w2"], p["g2"], p["be2"],
            p["w3"], p["b3"])

    # Advisory cost estimate for XLA's scheduler.
    flops = 2 * B * (in_dim * h1p + h1p * h2p + h2p * out_dim) + 10 * B * (h1p + h2p)
    bytes_accessed = (sum(int(a.size) * a.dtype.itemsize for a in args)
                      + B * out_dim * 4)
    transcendentals = h1p + h2p  # one rsqrt per (padded) feature column
    ce = pl.CostEstimate(flops=flops,
                         transcendentals=transcendentals,
                         bytes_accessed=bytes_accessed)

    # Everything fits comfortably in VMEM at these sizes -> single program,
    # whole-array blocks, no grid.
    return pl.pallas_call(
        functools.partial(_mlp_kernel, inv_b=1.0 / B),
        out_shape=jax.ShapeDtypeStruct((B, out_dim), jnp.float32),
        in_specs=[pl.BlockSpec(memory_space=pltpu.MemorySpace.VMEM)] * len(args),
        out_specs=pl.BlockSpec(memory_space=pltpu.MemorySpace.VMEM),
        cost_estimate=ce,
    )(*args)


def init_params(key, in_dim, n_hidden_1, n_hidden_2, out_dim):
    """Deterministic init mimicking nn.Linear's U(-1/sqrt(fan_in), 1/sqrt(fan_in)).
    Weights stored pre-transposed as (in, out); biases / bn params as (1, out)."""
    ks = jax.random.split(key, 6)

    def lin(kw, kb, fan_in, fan_out):
        bound = 1.0 / jnp.sqrt(fan_in)
        w = jax.random.uniform(kw, (fan_in, fan_out), jnp.float32, -bound, bound)
        b = jax.random.uniform(kb, (1, fan_out), jnp.float32, -bound, bound)
        return w, b

    w1, b1 = lin(ks[0], ks[1], in_dim, n_hidden_1)
    w2, b2 = lin(ks[2], ks[3], n_hidden_1, n_hidden_2)
    w3, b3 = lin(ks[4], ks[5], n_hidden_2, out_dim)

    return dict(
        w1=w1, b1=b1,
        g1=jnp.ones((1, n_hidden_1), jnp.float32),
        be1=jnp.zeros((1, n_hidden_1), jnp.float32),
        w2=w2, b2=b2,
        g2=jnp.ones((1, n_hidden_2), jnp.float32),
        be2=jnp.zeros((1, n_hidden_2), jnp.float32),
        w3=w3, b3=b3,
    )


def _reference_f32(x, p):
    """Pure-JAX f32 reference matching the PyTorch training-mode forward
    (includes the layer1/layer2 biases, which BN cancels)."""
    h = x @ p["w1"] + p["b1"]
    mu = h.mean(0, keepdims=True)
    var = ((h - mu) ** 2).mean(0, keepdims=True)
    h = jnp.maximum((h - mu) / jnp.sqrt(var + EPS) * p["g1"] + p["be1"], 0.0)
    h = h @ p["w2"] + p["b2"]
    mu = h.mean(0, keepdims=True)
    var = ((h - mu) ** 2).mean(0, keepdims=True)
    h = jnp.maximum((h - mu) / jnp.sqrt(var + EPS) * p["g2"] + p["be2"], 0.0)
    return h @ p["w3"] + p["b3"]


def _reference_mixed(x, p):
    """Pure-JAX reference mirroring the kernel's numerics (bf16 matmul operands,
    f32 stats, bias-free layers 1/2) for a tight structural check."""
    bf = jnp.bfloat16

    def bn_relu(h, g, be):
        mu = h.mean(0, keepdims=True)
        var = jnp.maximum((h * h).mean(0, keepdims=True) - mu * mu, 0.0)
        s = lax.rsqrt(var + EPS) * g
        return jnp.maximum(h * s + (be - mu * s), 0.0)

    h = jnp.dot(x.astype(bf), p["w1"].astype(bf), preferred_element_type=jnp.float32)
    h = bn_relu(h, p["g1"], p["be1"])
    h = jnp.dot(h.astype(bf), p["w2"].astype(bf), preferred_element_type=jnp.float32)
    h = bn_relu(h, p["g2"], p["be2"])
    return (jnp.dot(h.astype(bf), p["w3"].astype(bf),
                    preferred_element_type=jnp.float32) + p["b3"])


if __name__ == "__main__":
    B, in_dim, n_hidden_1, n_hidden_2, out_dim = 8, 32, 64, 64, 16

    key = jax.random.PRNGKey(0)
    kx, kp = jax.random.split(key)
    x = jax.random.normal(kx, (B, in_dim), jnp.float32)

    raw_params = init_params(kp, in_dim, n_hidden_1, n_hidden_2, out_dim)
    padded_params = prepare_params(raw_params)   # one-time canonical format

    out = neuralnetwork_forward(x, padded_params)
    out = jax.block_until_ready(out)

    assert out.shape == (B, out_dim)

    ref_mixed = _reference_mixed(x, raw_params)
    ref_f32 = _reference_f32(x, raw_params)
    assert jnp.allclose(out, ref_mixed, atol=5e-3, rtol=5e-3), (
        "mixed-precision mismatch", float(jnp.max(jnp.abs(out - ref_mixed))))
    assert jnp.allclose(out, ref_f32, atol=5e-2, rtol=5e-2), (
        "f32 reference mismatch", float(jnp.max(jnp.abs(out - ref_f32))))

    print("KERNEL_OK")
</pallas_src>

<mosaic_0001>
module attributes {stable_mosaic.version = 11 : i64} {
  func.func @_mlp_kernel(%arg0: memref<8x32xf32, #tpu.memory_space<vmem>>, %arg1: memref<32x128xbf16, #tpu.memory_space<vmem>>, %arg2: memref<1x128xf32, #tpu.memory_space<vmem>>, %arg3: memref<1x128xf32, #tpu.memory_space<vmem>>, %arg4: memref<128x128xbf16, #tpu.memory_space<vmem>>, %arg5: memref<1x128xf32, #tpu.memory_space<vmem>>, %arg6: memref<1x128xf32, #tpu.memory_space<vmem>>, %arg7: memref<128x16xbf16, #tpu.memory_space<vmem>>, %arg8: memref<1x16xf32, #tpu.memory_space<vmem>>, %arg9: memref<8x16xf32, #tpu.memory_space<vmem>>) attributes {dimension_semantics = [], scalar_prefetch = 0 : i64, scratch_operands = 0 : i64, tpu.core_type = #tpu.core_type<tc>} {
    %c0 = arith.constant 0 : index
    %c0_0 = arith.constant 0 : index
    %0 = vector.load %arg0[%c0, %c0_0] : memref<8x32xf32, #tpu.memory_space<vmem>>, vector<8x32xf32>
    %1 = arith.truncf %0 : vector<8x32xf32> to vector<8x32xbf16>
    %c0_1 = arith.constant 0 : index
    %c0_2 = arith.constant 0 : index
    %2 = vector.load %arg1[%c0_1, %c0_2] : memref<32x128xbf16, #tpu.memory_space<vmem>>, vector<32x128xbf16>
    %cst = arith.constant dense<0.000000e+00> : vector<8x128xf32>
    %3 = tpu.matmul %1, %2, %cst {dimension_numbers = #tpu.dot_dimension_numbers<[1], [0], [0], [1], [0, 0, 1, 1], [], []>} : vector<8x32xbf16>, vector<32x128xbf16>, vector<8x128xf32> -> vector<8x128xf32>
    %c0_3 = arith.constant 0 : index
    %c0_4 = arith.constant 0 : index
    %4 = vector.load %arg2[%c0_3, %c0_4] : memref<1x128xf32, #tpu.memory_space<vmem>>, vector<1x128xf32>
    %c0_5 = arith.constant 0 : index
    %c0_6 = arith.constant 0 : index
    %5 = vector.load %arg3[%c0_5, %c0_6] : memref<1x128xf32, #tpu.memory_space<vmem>>, vector<1x128xf32>
    %cst_7 = arith.constant dense<0.000000e+00> : vector<128xf32>
    %6 = vector.multi_reduction <add>, %3, %cst_7 [0] : vector<8x128xf32> to vector<128xf32>
    %7 = vector.shape_cast %6 : vector<128xf32> to vector<1x128xf32>
    %cst_8 = arith.constant 1.250000e-01 : f32
    %8 = vector.broadcast %cst_8 : f32 to vector<1x128xf32>
    %9 = arith.mulf %7, %8 : vector<1x128xf32>
    %10 = arith.mulf %3, %3 : vector<8x128xf32>
    %cst_9 = arith.constant dense<0.000000e+00> : vector<128xf32>
    %11 = vector.multi_reduction <add>, %10, %cst_9 [0] : vector<8x128xf32> to vector<128xf32>
    %12 = vector.shape_cast %11 : vector<128xf32> to vector<1x128xf32>
    %cst_10 = arith.constant 1.250000e-01 : f32
    %13 = vector.broadcast %cst_10 : f32 to vector<1x128xf32>
    %14 = arith.mulf %12, %13 : vector<1x128xf32>
    %15 = arith.mulf %9, %9 : vector<1x128xf32>
    %16 = arith.subf %14, %15 : vector<1x128xf32>
    %cst_11 = arith.constant 0.000000e+00 : f32
    %17 = vector.broadcast %cst_11 : f32 to vector<1x128xf32>
    %18 = arith.maximumf %16, %17 : vector<1x128xf32>
    %cst_12 = arith.constant 9.99999974E-6 : f32
    %19 = vector.broadcast %cst_12 : f32 to vector<1x128xf32>
    %20 = arith.addf %18, %19 : vector<1x128xf32>
    %21 = math.rsqrt %20 : vector<1x128xf32>
    %22 = arith.mulf %21, %4 : vector<1x128xf32>
    %23 = arith.mulf %9, %22 : vector<1x128xf32>
    %24 = arith.subf %5, %23 : vector<1x128xf32>
    %25 = vector.broadcast %22 : vector<1x128xf32> to vector<8x128xf32>
    %26 = arith.mulf %3, %25 : vector<8x128xf32>
    %27 = vector.broadcast %24 : vector<1x128xf32> to vector<8x128xf32>
    %28 = arith.addf %26, %27 : vector<8x128xf32>
    %cst_13 = arith.constant 0.000000e+00 : f32
    %29 = vector.broadcast %cst_13 : f32 to vector<8x128xf32>
    %30 = arith.maximumf %28, %29 : vector<8x128xf32>
    %31 = arith.truncf %30 : vector<8x128xf32> to vector<8x128xbf16>
    %c0_14 = arith.constant 0 : index
    %c0_15 = arith.constant 0 : index
    %32 = vector.load %arg4[%c0_14, %c0_15] : memref<128x128xbf16, #tpu.memory_space<vmem>>, vector<128x128xbf16>
    %cst_16 = arith.constant dense<0.000000e+00> : vector<8x128xf32>
    %33 = tpu.matmul %31, %32, %cst_16 {dimension_numbers = #tpu.dot_dimension_numbers<[1], [0], [0], [1], [0, 0, 1, 1], [], []>} : vector<8x128xbf16>, vector<128x128xbf16>, vector<8x128xf32> -> vector<8x128xf32>
    %c0_17 = arith.constant 0 : index
    %c0_18 = arith.constant 0 : index
    %34 = vector.load %arg5[%c0_17, %c0_18] : memref<1x128xf32, #tpu.memory_space<vmem>>, vector<1x128xf32>
    %c0_19 = arith.constant 0 : index
    %c0_20 = arith.constant 0 : index
    %35 = vector.load %arg6[%c0_19, %c0_20] : memref<1x128xf32, #tpu.memory_space<vmem>>, vector<1x128xf32>
    %cst_21 = arith.constant dense<0.000000e+00> : vector<128xf32>
    %36 = vector.multi_reduction <add>, %33, %cst_21 [0] : vector<8x128xf32> to vector<128xf32>
    %37 = vector.shape_cast %36 : vector<128xf32> to vector<1x128xf32>
    %cst_22 = arith.constant 1.250000e-01 : f32
    %38 = vector.broadcast %cst_22 : f32 to vector<1x128xf32>
    %39 = arith.mulf %37, %38 : vector<1x128xf32>
    %40 = arith.mulf %33, %33 : vector<8x128xf32>
    %cst_23 = arith.constant dense<0.000000e+00> : vector<128xf32>
    %41 = vector.multi_reduction <add>, %40, %cst_23 [0] : vector<8x128xf32> to vector<128xf32>
    %42 = vector.shape_cast %41 : vector<128xf32> to vector<1x128xf32>
    %cst_24 = arith.constant 1.250000e-01 : f32
    %43 = vector.broadcast %cst_24 : f32 to vector<1x128xf32>
    %44 = arith.mulf %42, %43 : vector<1x128xf32>
    %45 = arith.mulf %39, %39 : vector<1x128xf32>
    %46 = arith.subf %44, %45 : vector<1x128xf32>
    %cst_25 = arith.constant 0.000000e+00 : f32
    %47 = vector.broadcast %cst_25 : f32 to vector<1x128xf32>
    %48 = arith.maximumf %46, %47 : vector<1x128xf32>
    %cst_26 = arith.constant 9.99999974E-6 : f32
    %49 = vector.broadcast %cst_26 : f32 to vector<1x128xf32>
    %50 = arith.addf %48, %49 : vector<1x128xf32>
    %51 = math.rsqrt %50 : vector<1x128xf32>
    %52 = arith.mulf %51, %34 : vector<1x128xf32>
    %53 = arith.mulf %39, %52 : vector<1x128xf32>
    %54 = arith.subf %35, %53 : vector<1x128xf32>
    %55 = vector.broadcast %52 : vector<1x128xf32> to vector<8x128xf32>
    %56 = arith.mulf %33, %55 : vector<8x128xf32>
    %57 = vector.broadcast %54 : vector<1x128xf32> to vector<8x128xf32>
    %58 = arith.addf %56, %57 : vector<8x128xf32>
    %cst_27 = arith.constant 0.000000e+00 : f32
    %59 = vector.broadcast %cst_27 : f32 to vector<8x128xf32>
    %60 = arith.maximumf %58, %59 : vector<8x128xf32>
    %61 = arith.truncf %60 : vector<8x128xf32> to vector<8x128xbf16>
    %c0_28 = arith.constant 0 : index
    %c0_29 = arith.constant 0 : index
    %62 = vector.load %arg7[%c0_28, %c0_29] : memref<128x16xbf16, #tpu.memory_space<vmem>>, vector<128x16xbf16>
    %cst_30 = arith.constant dense<0.000000e+00> : vector<8x16xf32>
    %63 = tpu.matmul %61, %62, %cst_30 {dimension_numbers = #tpu.dot_dimension_numbers<[1], [0], [0], [1], [0, 0, 1, 1], [], []>} : vector<8x128xbf16>, vector<128x16xbf16>, vector<8x16xf32> -> vector<8x16xf32>
    %c0_31 = arith.constant 0 : index
    %c0_32 = arith.constant 0 : index
    %64 = vector.load %arg8[%c0_31, %c0_32] : memref<1x16xf32, #tpu.memory_space<vmem>>, vector<1x16xf32>
    %65 = vector.broadcast %64 : vector<1x16xf32> to vector<8x16xf32>
    %66 = arith.addf %63, %65 : vector<8x16xf32>
    %c0_33 = arith.constant 0 : index
    %c0_34 = arith.constant 0 : index
    %67 = vector.load %arg9[%c0_33, %c0_34] : memref<8x16xf32, #tpu.memory_space<vmem>>, vector<8x16xf32>
    tpu.vector_store %arg9[%c0_33, %c0_34], %66 {strides = array<i32>} : memref<8x16xf32, #tpu.memory_space<vmem>>, vector<8x16xf32>,
    return
  }
}

</mosaic_0001>

<bundles_post_ra>
// kernel: tpu_custom_call.1
= control target key start
LH: loop header
LB: loop body
LE: loop exit
PB: predicated region body
PF: predicated region fallthrough
CT: control target
= control target key end

     0   :  { %14 = vsyncpa [#allocation3], 0  ;;  %s803_s0 = inlined_call_operand.hbm [shape: f32[8,32], index: 0, kind: input, shape index: {}]   ;;  %s804_s1 = inlined_call_operand.vmem [shape: bf16[32,128], index: 1, kind: input, shape index: {}]   ;;  %s805_s2 = inlined_call_operand.vmem [shape: f32[1,128], index: 2, kind: input, shape index: {}]   ;;  %s806_s3 = inlined_call_operand.vmem [shape: f32[1,128], index: 3, kind: input, shape index: {}]   ;;  %s807_s4 = inlined_call_operand.vmem [shape: bf16[128,128], index: 4, kind: input, shape index: {}]   ;;  %s808_s5 = inlined_call_operand.hbm [shape: f32[1,128], index: 5, kind: input, shape index: {}]   ;;  %s809_s6 = inlined_call_operand.vmem [shape: f32[1,128], index: 6, kind: input, shape index: {}]   ;;  %s810_s7 = inlined_call_operand.vmem [shape: bf16[128,16], index: 7, kind: input, shape index: {}]   ;;  %s811_s8 = inlined_call_operand.vmem [shape: f32[1,16], index: 8, kind: input, shape index: {}]   ;;  %s812_s9 = inlined_call_operand.hbm [shape: f32[8,16], index: 9, kind: output, shape index: {}]  }
   0x1   :  { %15 = vsyncpa [#allocation6], 0 }
   0x2   :  { %16 = vsyncpa [#allocation4], 0  ;;  %s619_s30 = smov [#allocation2]   ;;  %s620_s11 = smov [#allocation5]  }
   0x3   :  { %s23_s10 = sshll.u32 %s619_s30, 4  ;;  %s41_s12 = sshll.u32 %s620_s11, 4  ;;  %s24_s10 = int_to_ptr.vmem [resolvable:$true] %s23_s10  ;;  %s42_s12 = int_to_ptr.vmem [resolvable:$true] %s41_s12 }
   0x4   :  { %s547_s15 = scalar_lea.hbm %s803_s0, 128 }
   0x5   :  { %p548_p0 = scmp.ne.s32.totalorder %s803_s0, %s547_s15  ;;  %p551_p1 = scmp.lt.u32.totalorder %s547_s15, %s803_s0 }
   0x7   :  { %p553_p2 = pnand %p551_p1, %p548_p0 }
   0x9   :  { %556 = shalt.err (!%p553_p2)
}
   0xa   :  { %s557_s20 = scalar_lea.vmem %s24_s10, 128  ;;  %p562_p4 = scmp.lt.s32.totalorder %s24_s10, %s24_s10 }
   0xb   :  { %p558_p3 = scmp.ne.s32.totalorder %s24_s10, %s557_s20  ;;  %p563_p5 = scmp.lt.s32.totalorder %s557_s20, %s557_s20 }
   0xd   :  { %p564_p6 = por %p563_p5, %p562_p4 }
   0xf   :  { %p565_p7 = pnand %p564_p6, %p558_p3 }
  0x11   :  { %568 = shalt.err (!%p565_p7)
}
  0x12   :  { %26 = dma.hbm_to_vmem [thread:$0]  %s803_s0, 128, %s24_s10, [#allocation3]  }
  0x13   :  { %s569_s25 = scalar_lea.hbm %s808_s5, 16 }
  0x14   :  { %p570_p8 = scmp.ne.s32.totalorder %s808_s5, %s569_s25  ;;  %p573_p9 = scmp.lt.u32.totalorder %s569_s25, %s808_s5 }
  0x16   :  { %p575_p10 = pnand %p573_p9, %p570_p8 }
  0x18   :  { %578 = shalt.err (!%p575_p10)
}
  0x19   :  { %s579_s30 = scalar_lea.vmem %s42_s12, 16  ;;  %s583_s11 = scalar_lea.vmem %s42_s12, 32 }
  0x1a   :  { %p580_p11 = scmp.ne.s32.totalorder %s42_s12, %s579_s30  ;;  %p584_p12 = scmp.lt.s32.totalorder %s42_s12, %s42_s12 }
  0x1b   :  { %p585_p13 = scmp.lt.s32.totalorder %s583_s11, %s579_s30 }
  0x1d   :  { %p586_p0 = por %p585_p13, %p584_p12 }
  0x1f   :  { %p587_p1 = pnand %p586_p0, %p580_p11 }
  0x21   :  { %590 = shalt.err (!%p587_p1)
}
  0x22   :  { %44 = dma.hbm_to_vmem [thread:$0]  %s808_s5, 16, %s42_s12, [#allocation6]  }
  0x23   :  { %613 = dma.done.wait [#allocation3], 128  }
  0x24   :  { %614 = vsyncadd [#allocation3], 4294967168 }
  0x25   :  { %615 = dma.done.wait [#allocation6], 16  }
  0x26   :  { %616 = vsyncadd [#allocation6], 4294967280  ;;  %v621_v0 = vmov 0.0   ;;  %vm622_vm0 = vmmov 0   ;;  %v525_v1 = vld [vmem:[%s804_s1] sm:$0xff]   ;;  %v526_v2 = vld [vmem:[%s804_s1 + $0x8] sm:$0xff]   ;;  %v145_v36 = vlaneseq }
  0x27   :  { %472 = vmatprep.subr.bf16.mxu0 %v621_v0  ;;  %476 = vmatprep.mubr.msk.bf16.mxu0 %vm622_vm0, %v621_v0  ;;  %v58_v3 = vld [vmem:[#allocation2] sm:$0xff]  ;;  %vm76_vm1 = vcmask 261120   ;;  %v528_v6 = vld [vmem:[%s807_s4 + $0x8] sm:$0xff]   ;;  %v529_v7 = vld [vmem:[%s807_s4 + $0x10] sm:$0xff]   ;;  %s623_s26 = smov [#allocation7]   ;;  %vm413_vm2 = vcmask 130048  }
  0x28   :  { %480 = vmatprep.subr.bf16.mxu1 %v621_v0  ;;  %496 = vmatprep.mubr.msk.bf16.mxu1 %vm622_vm0, %v621_v0  ;;  %v59_v4 = vpack.c.bf16 %v58_v3, %v58_v3  ;;  %v527_v5 = vld [vmem:[%s807_s4] sm:$0xff]   ;;  %v530_v8 = vld [vmem:[%s807_s4 + $0x18] sm:$0xff]   ;;  %v532_v10 = vld [vmem:[%s807_s4 + $0x28] sm:$0xff]   ;;  %v146_v37 = vshrl.u32 %v145_v36, 7  ;;  %s421_s27 = sshll.u32 %s623_s26, 4  ;;  %s422_s27 = int_to_ptr.vmem [resolvable:$true] %s421_s27 }
  0x29   :  { %473 = vmatpush3.bf16.msra.mxu0 %v525_v1  ;;  %481 = vmatpush3.bf16.msra.mxu1 %v527_v5  ;;  %v531_v9 = vld [vmem:[%s807_s4 + $0x20] sm:$0xff]   ;;  %v533_v11 = vld [vmem:[%s807_s4 + $0x30] sm:$0xff]   ;;  %v534_v12 = vld [vmem:[%s807_s4 + $0x38] sm:$0xff]   ;;  %p596_p3 = scmp.lt.s32.totalorder %s422_s27, %s422_s27 }
  0x2a   :  { %474 = vmatprep.subr.bf16.mxu0 %v621_v0  ;;  %482 = vmatprep.subr.bf16.mxu1 %v621_v0  ;;  %v120_v38 = vld [vmem:[%s805_s2] sm:$0x1]  ;;  %v745_v39 = vsub.s32 0, %v146_v37  ;;  %v536_v52 = vld [vmem:[%s810_s7 + $0x8] sm:$0xff]   ;;  %v537_v53 = vld [vmem:[%s810_s7 + $0x10] sm:$0xff]  }
  0x2b   :  { %v121_v42 = vld [vmem:[%s806_s3] sm:$0x1]  ;;  %v538_v54 = vld [vmem:[%s810_s7 + $0x18] sm:$0xff]   ;;  %v540_v56 = vld [vmem:[%s810_s7 + $0x28] sm:$0xff]  }
  0x2c   :  { %v535_v51 = vld [vmem:[%s810_s7] sm:$0xff]   ;;  %v541_v57 = vld [vmem:[%s810_s7 + $0x30] sm:$0xff]   ;;  %v542_v58 = vld [vmem:[%s810_s7 + $0x38] sm:$0xff]  }
  0x2d   :  { %475 = vmatpush3.bf16.msra.mxu0 %v526_v2  ;;  %483 = vmatpush3.bf16.msra.mxu1 %v528_v6  ;;  %v539_v55 = vld [vmem:[%s810_s7 + $0x20] sm:$0xff]  }
  0x2e   :  { %500 = vmatprep.subr.bf16.mxu0 %v621_v0  ;;  %484 = vmatprep.subr.bf16.mxu1 %v621_v0 }
  0x30   :  { %477 = vmatmul.mubr.msk.bf16.vlgmr.msra.gmra.mrb[0].mxu0 %vm76_vm1, %v59_v4 }
  0x31   :  { %516 = vmatprep.mubr.msk.bf16.mxu0 %vm622_vm0, %v621_v0  ;;  %485 = vmatpush3.bf16.msra.mxu1 %v529_v7 }
  0x32   :  { %486 = vmatprep.subr.bf16.mxu1 %v621_v0  ;;  %501 = vmatpush3.bf16.msra.mxu0 %v535_v51 }
  0x33   :  { %502 = vmatprep.subr.bf16.mxu0 %v621_v0 }
  0x35   :  { %487 = vmatpush3.bf16.msra.mxu1 %v530_v8 }
  0x36   :  { %488 = vmatprep.subr.bf16.mxu1 %v621_v0  ;;  %503 = vmatpush3.bf16.msra.mxu0 %v536_v52 }
  0x37   :  { %504 = vmatprep.subr.bf16.mxu0 %v621_v0 }
  0x39   :  { %489 = vmatpush3.bf16.msra.mxu1 %v531_v9 }
  0x3a   :  { %490 = vmatprep.subr.bf16.mxu1 %v621_v0  ;;  %505 = vmatpush3.bf16.msra.mxu0 %v537_v53 }
  0x3b   :  { %506 = vmatprep.subr.bf16.mxu0 %v621_v0 }
  0x3d   :  { %491 = vmatpush3.bf16.msra.mxu1 %v532_v10 }
  0x3e   :  { %492 = vmatprep.subr.bf16.mxu1 %v621_v0  ;;  %507 = vmatpush3.bf16.msra.mxu0 %v538_v54 }
  0x3f   :  { %508 = vmatprep.subr.bf16.mxu0 %v621_v0 }
  0x41   :  { %493 = vmatpush3.bf16.msra.mxu1 %v533_v11 }
  0x42   :  { %494 = vmatprep.subr.bf16.mxu1 %v621_v0  ;;  %509 = vmatpush3.bf16.msra.mxu0 %v539_v55 }
  0x43   :  { %510 = vmatprep.subr.bf16.mxu0 %v621_v0 }
  0x45   :  { %495 = vmatpush3.bf16.msra.mxu1 %v534_v12 }
  0x46   :  { %511 = vmatpush3.bf16.msra.mxu0 %v540_v56 }
  0x47   :  { %512 = vmatprep.subr.bf16.mxu0 %v621_v0 }
  0x4a   :  { %513 = vmatpush3.bf16.msra.mxu0 %v541_v57 }
  0x4b   :  { %514 = vmatprep.subr.bf16.mxu0 %v621_v0 }
  0x4e   :  { %515 = vmatpush3.bf16.msra.mxu0 %v542_v58 }
 0x103   :  { %v114_v13 = vpop.f32.mrb[0].mxu0 }
 0x104   :  { %v122_v14 = vrot.slane %v114_v13, 4  ;;  %v129_v15 = vmul.f32 %v114_v13, %v114_v13  ;;  %v478_v16 = vpop.f32.mrb[1].mxu0 }
 0x105   :  { %v117_v17 = vpop.f32.mrb[2].mxu0 }
 0x106   :  { %v123_v18 = vadd.f32 %v122_v14, %v114_v13  ;;  %v130_v19 = vrot.slane %v129_v15, 4  ;;  %v479_v20 = vpop.f32.mrb[3].mxu0 }
 0x108   :  { %v124_v21 = vrot.slane %v123_v18, 2  ;;  %v131_v22 = vadd.f32 %v130_v19, %v129_v15 }
 0x10a   :  { %v125_v23 = vadd.f32 %v124_v21, %v123_v18  ;;  %v132_v24 = vrot.slane %v131_v22, 2  ;;  %v263_v18 = vld [vmem:[#allocation5] sm:$0x1]  ;;  %v264_v21 = vld [vmem:[%s809_s6] sm:$0x1]  ;;  %s591_s6 = scalar_lea.vmem %s422_s27, 128 }
 0x10b   :  { %p592_p2 = scmp.ne.s32.totalorder %s422_s27, %s591_s6  ;;  %p597_p4 = scmp.lt.s32.totalorder %s591_s6, %s591_s6 }
 0x10c   :  { %v126_v25 = vrot.slane %v125_v23, 1  ;;  %v133_v26 = vadd.f32 %v132_v24, %v131_v22 }
 0x10d   :  { %p598_p5 = por %p597_p4, %p596_p3 }
 0x10e   :  { %v127_v27 = vadd.f32 %v126_v25, %v125_v23  ;;  %v134_v28 = vrot.slane %v133_v26, 1 }
 0x10f   :  { %p599_p6 = pnand %p598_p5, %p592_p2 }
 0x110   :  { %v128_v29 = vmul.f32 0.125, %v127_v27  ;;  %v135_v30 = vadd.f32 %v134_v28, %v133_v26 }
 0x112   :  { %v136_v31 = vmul.f32 0.125, %v135_v30  ;;  %v137_v32 = vmul.f32 %v128_v29, %v128_v29  ;;  %v442_v30 = vld [vmem:[%s811_s8] ss:$0 sm:$0xff] }
 0x114   :  { %v138_v33 = vsub.f32 %v136_v31, %v137_v32 }
 0x116   :  { %v139_v34 = vmax.f32 %v138_v33, 0.0 }
 0x118   :  { %v140_v35 = vadd.f32 1e-05, %v139_v34 }
 0x11a   :  { %543 = vrsqrt.f32 %v140_v35 }
 0x124   :  { %v544_v40 = vpop.eup %543 }
 0x125   :  { %v142_v41 = vmul.f32 %v544_v40, %v120_v38 }
 0x127   :  { %v148_v43 = vrot.slane %v142_v41, %v745_v39  ;;  %v143_v44 = vmul.f32 %v142_v41, %v128_v29 }
 0x129   :  { %v144_v45 = vsub.f32 %v121_v42, %v143_v44  ;;  %v149_v46 = vmul.f32 %v148_v43, %v114_v13 }
 0x12b   :  { %v154_v47 = vrot.slane %v144_v45, %v745_v39 }
 0x12d   :  { %v156_v48 = vadd.f32 %v154_v47, %v149_v46 }
 0x12f   :  { %v157_v49 = vmax.f32 %v156_v48, 0.0 }
 0x131   :  { %v158_v50 = vpack.c.bf16 %v157_v49, %v157_v49 }
 0x133   :  { %497 = vmatmul.mubr.bf16.vlgmr.msra.gmra.mrb[0].mxu1 %v158_v50 }
 0x206   :  { %v257_v59 = vpop.f32.mrb[0].mxu1 }
 0x207   :  { %v265_v60 = vrot.slane %v257_v59, 4  ;;  %v272_v61 = vmul.f32 %v257_v59, %v257_v59  ;;  %v498_v62 = vpop.f32.mrb[1].mxu1 }
 0x208   :  { %v260_v63 = vpop.f32.mrb[2].mxu1 }
 0x209   :  { %v266_v1 = vadd.f32 %v265_v60, %v257_v59  ;;  %v273_v2 = vrot.slane %v272_v61, 4  ;;  %v499_v3 = vpop.f32.mrb[3].mxu1 }
 0x20b   :  { %v267_v4 = vrot.slane %v266_v1, 2  ;;  %v274_v5 = vadd.f32 %v273_v2, %v272_v61 }
 0x20d   :  { %v268_v6 = vadd.f32 %v267_v4, %v266_v1  ;;  %v275_v7 = vrot.slane %v274_v5, 2 }
 0x20f   :  { %v269_v8 = vrot.slane %v268_v6, 1  ;;  %v276_v9 = vadd.f32 %v275_v7, %v274_v5 }
 0x211   :  { %v270_v0 = vadd.f32 %v269_v8, %v268_v6  ;;  %v277_v10 = vrot.slane %v276_v9, 1 }
 0x213   :  { %v271_v11 = vmul.f32 0.125, %v270_v0  ;;  %v278_v12 = vadd.f32 %v277_v10, %v276_v9 }
 0x215   :  { %v279_v13 = vmul.f32 0.125, %v278_v12  ;;  %v280_v14 = vmul.f32 %v271_v11, %v271_v11 }
 0x217   :  { %v281_v15 = vsub.f32 %v279_v13, %v280_v14 }
 0x219   :  { %v282_v16 = vmax.f32 %v281_v15, 0.0 }
 0x21b   :  { %v283_v17 = vadd.f32 1e-05, %v282_v16 }
 0x21d   :  { %545 = vrsqrt.f32 %v283_v17 }
 0x227   :  { %v546_v19 = vpop.eup %545 }
 0x228   :  { %v285_v20 = vmul.f32 %v546_v19, %v263_v18 }
 0x22a   :  { %v286_v22 = vmul.f32 %v285_v20, %v271_v11  ;;  %v291_v23 = vrot.slane %v285_v20, %v745_v39 }
 0x22c   :  { %v287_v24 = vsub.f32 %v264_v21, %v286_v22  ;;  %v292_v25 = vmul.f32 %v291_v23, %v257_v59 }
 0x22e   :  { %v297_v26 = vrot.slane %v287_v24, %v745_v39 }
 0x230   :  { %v299_v27 = vadd.f32 %v297_v26, %v292_v25 }
 0x232   :  { %v300_v28 = vmax.f32 %v299_v27, 0.0 }
 0x234   :  { %v301_v29 = vpack.c.bf16 %v300_v28, %v300_v28 }
 0x236   :  { %517 = vmatmul.mubr.bf16.vlgmr.msra.gmra.mrb[4].mxu0 %v301_v29 }
 0x309   :  { %v407_v31 = vpop.f32.mrb[4].mxu0 }
 0x30a   :  { %v408_v32 = vadd.f32 %v442_v30, %v407_v31  ;;  %v518_v33 = vpop.f32.mrb[5].mxu0 }
 0x30b   :  { %v410_v34 = vpop.f32.mrb[6].mxu0 }
 0x30c   :  { %v519_v35 = vpop.f32.mrb[7].mxu0  ;;  %414 = vst.msk [vmem:[#allocation7] sm:$0xff] %vm413_vm2, %v408_v32 }
 0x30d   :  { %602 = shalt.err (!%p599_p6)
}
 0x30e   :  { %s603_s8 = scalar_lea.hbm %s812_s9, 128 }
 0x30f   :  { %p604_p7 = scmp.ne.s32.totalorder %s812_s9, %s603_s8  ;;  %p607_p8 = scmp.lt.u32.totalorder %s603_s8, %s812_s9 }
 0x311   :  { %p609_p9 = pnand %p607_p8, %p604_p7 }
 0x313   :  { %612 = shalt.err (!%p609_p9)
}
 0x314   :  { %424 = dma.vmem_to_hbm [thread:$0]  %s422_s27, 128, %s812_s9, [#allocation4]  }
 0x315   :  { %617 = dma.done.wait [#allocation4], 128  }
 0x316   :  { %618 = vsyncadd [#allocation4], 4294967168 }
 0x317   :  { %428 = vsyncpa [#allocation3], 1 }
 0x318   :  { %429 = vsyncpa [#allocation6], 1 }
 0x319   :  { %430 = vsyncpa [#allocation4], 1 }

</bundles_post_ra>
